<compile_context>
chip_gen: v7x
topology: tpu7x:2x2x1
jax: 0.10.0
libtpu: 0.0.40
codegen_flags: <defaults>
</compile_context>

<pallas_src>
import jax
import jax.numpy as jnp
from jax import lax
from jax.experimental import pallas as pl
from jax.experimental.pallas import tpu as pltpu

LANE = 128
BLOCK_BYTES = 4 * 1024 * 1024          # per-input block; Pallas double-buffers it
_SUBLANE = {1: 32, 2: 16, 4: 8}        # minimum sublane tile height per itemsize
_NATIVE_INT_DTYPES = (jnp.int8, jnp.uint8, jnp.int16, jnp.uint16, jnp.int32, jnp.uint32)


def _cdiv(a, b):
    return -(-a // b)


def _round_up(x, m):
    return _cdiv(x, m) * m


def _auto_split():
    """Number of per-TensorCore partial-count rows (2 only on 2-TC chips, i.e. v7x)."""
    try:
        kind = jax.devices()[0].device_kind.lower()
    except Exception:
        return 1
    return 2 if ("v7" in kind or "7x" in kind) else 1


def _make_kernel(block_rows, sub, rows, cpc, needs_mask):
    nb = block_rows // sub  # number of (sub, LANE) strips per block (static)

    def strip_loop(p_ref, t_ref, limit):
        # limit is None  -> unmasked variant (all rows of the block are valid)
        # limit is traced-> only rows < limit are valid (tail / duplicate block)
        def body(s, carry):
            tp_acc, fp_acc, fn_acc = carry
            off = pl.multiple_of(s * sub, sub)
            p = p_ref[pl.ds(off, sub), :]
            t = t_ref[pl.ds(off, sub), :]
            eq = p == t
            neq = jnp.logical_not(eq)
            p_nz = p != 0
            t_nz = t != 0
            if limit is not None:
                row = jax.lax.broadcasted_iota(jnp.int32, (sub, LANE), 0) + off
                valid = row < limit
                p_nz = jnp.logical_and(p_nz, valid)
                t_nz = jnp.logical_and(t_nz, valid)
            tp_acc = tp_acc + jnp.logical_and(eq, p_nz).astype(jnp.int32)
            fp_acc = fp_acc + jnp.logical_and(neq, p_nz).astype(jnp.int32)
            fn_acc = fn_acc + jnp.logical_and(neq, t_nz).astype(jnp.int32)
            return tp_acc, fp_acc, fn_acc

        zero = jnp.zeros((sub, LANE), jnp.int32)
        return lax.fori_loop(0, nb, body, (zero, zero, zero), unroll=min(nb, 8))

    def kernel(p_ref, t_ref, out_ref):
        c = pl.program_id(0)
        i = pl.program_id(1)

        @pl.when(i == 0)
        def _init():
            out_ref[...] = jnp.zeros_like(out_ref)

        def accumulate(tp, fp, fn):
            out_ref[0, 0] += tp
            out_ref[0, 1] += fp
            out_ref[0, 2] += fn

        if not needs_mask:
            tp, fp, fn = strip_loop(p_ref, t_ref, None)
            accumulate(tp, fp, fn)
        else:
            gc = c * cpc + i                      # unclamped global chunk index
            limit = rows - gc * block_rows        # valid rows in this block

            @pl.when(limit >= block_rows)         # interior block: cheap unmasked path
            def _full():
                tp, fp, fn = strip_loop(p_ref, t_ref, None)
                accumulate(tp, fp, fn)

            @pl.when(jnp.logical_and(limit > 0, limit < block_rows))  # partial tail
            def _partial():
                tp, fp, fn = strip_loop(p_ref, t_ref, limit)
                accumulate(tp, fp, fn)
            # limit <= 0: clamped duplicate block (odd chunk count with 2-way split);
            # contributes nothing.

    return kernel


def _prepare(y_hat, y):
    """Flatten and keep labels at their native (narrow) integer width when possible."""
    def canon(x):
        x = jnp.reshape(x, (-1,))
        if x.dtype == jnp.bool_:
            return x.astype(jnp.uint8)
        if any(x.dtype == d for d in _NATIVE_INT_DTYPES):
            return x
        # float / 64-bit labels: fall back to int32 (labels assumed integral)
        return x.astype(jnp.int32)

    p = canon(y_hat)
    t = canon(y)
    if p.dtype != t.dtype:
        p = p.astype(jnp.int32)
        t = t.astype(jnp.int32)
    return p, t


def hard_dice(y_hat, y, *, block_bytes=BLOCK_BYTES, force_split=None):
    assert y_hat.shape == y.shape, "y_hat and y must have the same shape"

    n = 1
    for d in y_hat.shape:
        n *= d
    if n == 0:
        return jnp.float32(1.0)  # both empty -> 1.0

    p, t = _prepare(y_hat, y)
    itemsize = p.dtype.itemsize
    sub = _SUBLANE[itemsize]

    # Zero padding is neutral: padded elements are equal and class 0, so they add to
    # none of TP/FP/FN.  Common image-label sizes (n % (sub*128) == 0) take the
    # no-copy path.
    padded_n = _round_up(n, sub * LANE)
    if padded_n != n:
        pad = padded_n - n
        p = jnp.pad(p, (0, pad))
        t = jnp.pad(t, (0, pad))

    rows = padded_n // LANE
    p2 = p.reshape(rows, LANE)
    t2 = t.reshape(rows, LANE)

    budget_rows = max(sub, (block_bytes // (LANE * itemsize)) // sub * sub)
    block_rows = min(budget_rows, rows)
    num_chunks = _cdiv(rows, block_rows)

    n_split = force_split if force_split is not None else _auto_split()
    if num_chunks < 2:
        n_split = 1
    cpc = _cdiv(num_chunks, n_split)  # chunks handled per core-row of the grid
    needs_mask = (rows % block_rows != 0) or (n_split * cpc != num_chunks)

    def in_index_map(c, i):
        # Clamp so duplicate blocks (odd chunk counts with the 2-way split) stay
        # in-bounds; their contribution is skipped inside the kernel.
        return (jnp.minimum(c * cpc + i, num_chunks - 1), 0)

    kernel = _make_kernel(block_rows, sub, rows, cpc, needs_mask)

    counts = pl.pallas_call(
        kernel,
        out_shape=jax.ShapeDtypeStruct((n_split, 3, sub, LANE), jnp.int32),
        grid=(n_split, cpc),
        in_specs=[
            pl.BlockSpec((block_rows, LANE), in_index_map),
            pl.BlockSpec((block_rows, LANE), in_index_map),
        ],
        out_specs=pl.BlockSpec((1, 3, sub, LANE), lambda c, i: (c, 0, 0, 0)),
        compiler_params=pltpu.CompilerParams(
            dimension_semantics=("parallel", "arbitrary"),
            vmem_limit_bytes=32 * 1024 * 1024,
        ),
    )(p2, t2)

    # Tiny epilogue in plain JAX: combine per-core partial counts and compute dice.
    # Accumulate in float32 to avoid int32 overflow for very large inputs.
    totals = jnp.sum(counts, axis=(0, 2, 3), dtype=jnp.float32)  # (tp, fp, fn)
    tp, fp, fn = totals[0], totals[1], totals[2]
    denom = 2.0 * tp + fp + fn
    # fp+fn == 0  <=>  y_hat == y everywhere.  If additionally tp == 0 (denom == 0) we
    # are in HardDice's "both empty" case -> 1.0; with tp > 0 the formula already gives 1.
    return jnp.where(denom > 0.0, (2.0 * tp) / jnp.maximum(denom, 1.0), jnp.float32(1.0))


def _ref_hard_dice(y_hat, y):
    # pure-JAX reference of the same semantics, for sanity checks
    p = y_hat.astype(jnp.int32)
    t = y.astype(jnp.int32)
    eq = p == t
    tp = jnp.sum(jnp.logical_and(eq, p != 0)).astype(jnp.float32)
    fp = jnp.sum(jnp.logical_and(~eq, p != 0)).astype(jnp.float32)
    fn = jnp.sum(jnp.logical_and(~eq, t != 0)).astype(jnp.float32)
    denom = 2.0 * tp + fp + fn
    dice = jnp.where(denom > 0.0, 2.0 * tp / jnp.maximum(denom, 1.0), 0.0)
    return jnp.where(jnp.all(eq), jnp.float32(1.0), dice)


if __name__ == "__main__":
    key = jax.random.PRNGKey(0)
    k1, k2, k3, k4, k5, k6 = jax.random.split(key, 6)

    def check(d, d_ref):
        assert abs(float(d) - float(d_ref)) < 1e-5, (float(d), float(d_ref))

    # 1) common case: int32 labels, zero-copy path, single chunk, no masking
    shape = (2, 4, 16, 16)
    y_hat = jax.random.randint(k1, shape, 0, 4, dtype=jnp.int32)
    y = jax.random.randint(k2, shape, 0, 4, dtype=jnp.int32)
    d = hard_dice(y_hat, y)
    jax.block_until_ready(d)
    check(d, _ref_hard_dice(y_hat, y))

    # 2) all-equal cases -> exactly 1.0 (including the all-background "both empty" case)
    d_eq = hard_dice(y, y)
    jax.block_until_ready(d_eq)
    assert float(d_eq) == 1.0
    zeros = jnp.zeros(shape, jnp.int32)
    d_z = hard_dice(zeros, zeros)
    jax.block_until_ready(d_z)
    assert float(d_z) == 1.0

    # 3) multi-chunk + forced 2-way split + clamped duplicate block (v7x-style path)
    shape2 = (3, 4, 16, 16)
    y_hat2 = jax.random.randint(k3, shape2, 0, 4, dtype=jnp.int32)
    y2 = jax.random.randint(k4, shape2, 0, 4, dtype=jnp.int32)
    d2 = hard_dice(y_hat2, y2, block_bytes=8 * LANE * 4, force_split=2)
    jax.block_until_ready(d2)
    check(d2, _ref_hard_dice(y_hat2, y2))

    # 4) partial tail block (rows % block_rows != 0) with the pl.when-gated mask
    d3 = hard_dice(y_hat2, y2, block_bytes=16 * LANE * 4, force_split=1)
    jax.block_until_ready(d3)
    check(d3, _ref_hard_dice(y_hat2, y2))

    # 5) narrow int8 labels streamed at native width (no wrapper astype HBM pass)
    d4 = hard_dice(y_hat.astype(jnp.int8), y.astype(jnp.int8))
    jax.block_until_ready(d4)
    check(d4, _ref_hard_dice(y_hat, y))

    # 6) element count not a multiple of 128 (wrapper zero-pad path)
    a = jax.random.randint(k5, (1000,), 0, 3, dtype=jnp.int32)
    b = jax.random.randint(k6, (1000,), 0, 3, dtype=jnp.int32)
    d5 = hard_dice(a, b)
    jax.block_until_ready(d5)
    check(d5, _ref_hard_dice(a, b))

    print("KERNEL_OK")
</pallas_src>

<mosaic_0001>
module attributes {stable_mosaic.version = 11 : i64} {
  func.func @kernel(%arg0: i32, %arg1: i32, %arg2: memref<16x128xi32, #tpu.memory_space<vmem>>, %arg3: memref<16x128xi32, #tpu.memory_space<vmem>>, %arg4: memref<1x3x8x128xi32, #tpu.memory_space<vmem>>) attributes {dimension_semantics = [#tpu.dimension_semantics<parallel>, #tpu.dimension_semantics<arbitrary>], iteration_bounds = array<i64: 1, 1>, scalar_prefetch = 0 : i64, scratch_operands = 0 : i64, tpu.core_type = #tpu.core_type<tc>, window_params = [{transform_indices = @transform_0, window_bounds = array<i64: 16, 128>}, {transform_indices = @transform_1, window_bounds = array<i64: 16, 128>}, {transform_indices = @transform_2, window_bounds = array<i64: 1, 3, 8, 128>}]} {
    %c0_i32 = arith.constant 0 : i32
    %0 = arith.cmpi eq, %arg1, %c0_i32 : i32
    %1 = arith.extui %0 : i1 to i32
    %c0_i32_0 = arith.constant 0 : i32
    %2 = arith.cmpi ne, %1, %c0_i32_0 : i32
    scf.if %2 {
      %c0_i32_34 = arith.constant 0 : i32
      %64 = vector.broadcast %c0_i32_34 : i32 to vector<1x3x8x128xi32>
      %c0_35 = arith.constant 0 : index
      %c0_36 = arith.constant 0 : index
      %c0_37 = arith.constant 0 : index
      %c0_38 = arith.constant 0 : index
      %65 = vector.load %arg4[%c0_35, %c0_36, %c0_37, %c0_38] : memref<1x3x8x128xi32, #tpu.memory_space<vmem>>, vector<1x3x8x128xi32>
      tpu.vector_store %arg4[%c0_35, %c0_36, %c0_37, %c0_38], %64 {strides = array<i32>} : memref<1x3x8x128xi32, #tpu.memory_space<vmem>>, vector<1x3x8x128xi32>,
    } else {
    }
    %c0_i32_1 = arith.constant 0 : i32
    %3 = vector.broadcast %c0_i32_1 : i32 to vector<8x128xi32>
    %c0_i32_2 = arith.constant 0 : i32
    %c8_i32 = arith.constant 8 : i32
    %4 = arith.muli %c0_i32_2, %c8_i32 : i32
    %5 = tpu.assume_multiple %4, 8 : i32
    %6 = arith.index_cast %5 : i32 to index
    %c0 = arith.constant 0 : index
    %7 = vector.load %arg2[%6, %c0] : memref<16x128xi32, #tpu.memory_space<vmem>>, vector<8x128xi32>
    %8 = arith.index_cast %5 : i32 to index
    %c0_3 = arith.constant 0 : index
    %9 = vector.load %arg3[%8, %c0_3] : memref<16x128xi32, #tpu.memory_space<vmem>>, vector<8x128xi32>
    %10 = arith.cmpi eq, %7, %9 : vector<8x128xi32>
    %cst = arith.constant dense<true> : vector<8x128xi1>
    %11 = arith.xori %10, %cst : vector<8x128xi1>
    %c0_i32_4 = arith.constant 0 : i32
    %12 = vector.broadcast %c0_i32_4 : i32 to vector<8x128xi32>
    %13 = arith.cmpi ne, %7, %12 : vector<8x128xi32>
    %c0_i32_5 = arith.constant 0 : i32
    %14 = vector.broadcast %c0_i32_5 : i32 to vector<8x128xi32>
    %15 = arith.cmpi ne, %9, %14 : vector<8x128xi32>
    %16 = arith.andi %10, %13 : vector<8x128xi1>
    %17 = arith.extui %16 : vector<8x128xi1> to vector<8x128xi32>
    %18 = arith.addi %3, %17 : vector<8x128xi32>
    %19 = arith.andi %11, %13 : vector<8x128xi1>
    %20 = arith.extui %19 : vector<8x128xi1> to vector<8x128xi32>
    %21 = arith.addi %3, %20 : vector<8x128xi32>
    %22 = arith.andi %11, %15 : vector<8x128xi1>
    %23 = arith.extui %22 : vector<8x128xi1> to vector<8x128xi32>
    %24 = arith.addi %3, %23 : vector<8x128xi32>
    %c1_i32 = arith.constant 1 : i32
    %c8_i32_6 = arith.constant 8 : i32
    %25 = arith.muli %c1_i32, %c8_i32_6 : i32
    %26 = tpu.assume_multiple %25, 8 : i32
    %27 = arith.index_cast %26 : i32 to index
    %c0_7 = arith.constant 0 : index
    %28 = vector.load %arg2[%27, %c0_7] : memref<16x128xi32, #tpu.memory_space<vmem>>, vector<8x128xi32>
    %29 = arith.index_cast %26 : i32 to index
    %c0_8 = arith.constant 0 : index
    %30 = vector.load %arg3[%29, %c0_8] : memref<16x128xi32, #tpu.memory_space<vmem>>, vector<8x128xi32>
    %31 = arith.cmpi eq, %28, %30 : vector<8x128xi32>
    %cst_9 = arith.constant dense<true> : vector<8x128xi1>
    %32 = arith.xori %31, %cst_9 : vector<8x128xi1>
    %c0_i32_10 = arith.constant 0 : i32
    %33 = vector.broadcast %c0_i32_10 : i32 to vector<8x128xi32>
    %34 = arith.cmpi ne, %28, %33 : vector<8x128xi32>
    %c0_i32_11 = arith.constant 0 : i32
    %35 = vector.broadcast %c0_i32_11 : i32 to vector<8x128xi32>
    %36 = arith.cmpi ne, %30, %35 : vector<8x128xi32>
    %37 = arith.andi %31, %34 : vector<8x128xi1>
    %38 = arith.extui %37 : vector<8x128xi1> to vector<8x128xi32>
    %39 = arith.addi %18, %38 : vector<8x128xi32>
    %40 = arith.andi %32, %34 : vector<8x128xi1>
    %41 = arith.extui %40 : vector<8x128xi1> to vector<8x128xi32>
    %42 = arith.addi %21, %41 : vector<8x128xi32>
    %43 = arith.andi %32, %36 : vector<8x128xi1>
    %44 = arith.extui %43 : vector<8x128xi1> to vector<8x128xi32>
    %45 = arith.addi %24, %44 : vector<8x128xi32>
    %c2_i32 = arith.constant 2 : i32
    %c0_12 = arith.constant 0 : index
    %c0_13 = arith.constant 0 : index
    %c0_14 = arith.constant 0 : index
    %c0_15 = arith.constant 0 : index
    %46 = vector.load %arg4[%c0_12, %c0_13, %c0_14, %c0_15] : memref<1x3x8x128xi32, #tpu.memory_space<vmem>>, vector<1x1x8x128xi32>
    %47 = vector.shape_cast %46 : vector<1x1x8x128xi32> to vector<8x128xi32>
    %48 = arith.addi %47, %39 : vector<8x128xi32>
    %c0_16 = arith.constant 0 : index
    %c0_17 = arith.constant 0 : index
    %c0_18 = arith.constant 0 : index
    %c0_19 = arith.constant 0 : index
    %49 = vector.load %arg4[%c0_16, %c0_17, %c0_18, %c0_19] : memref<1x3x8x128xi32, #tpu.memory_space<vmem>>, vector<1x1x8x128xi32>
    %50 = vector.shape_cast %49 : vector<1x1x8x128xi32> to vector<8x128xi32>
    %51 = vector.shape_cast %48 : vector<8x128xi32> to vector<1x1x8x128xi32>
    tpu.vector_store %arg4[%c0_16, %c0_17, %c0_18, %c0_19], %51 {strides = array<i32>} : memref<1x3x8x128xi32, #tpu.memory_space<vmem>>, vector<1x1x8x128xi32>,
    %c0_20 = arith.constant 0 : index
    %c1 = arith.constant 1 : index
    %c0_21 = arith.constant 0 : index
    %c0_22 = arith.constant 0 : index
    %52 = vector.load %arg4[%c0_20, %c1, %c0_21, %c0_22] : memref<1x3x8x128xi32, #tpu.memory_space<vmem>>, vector<1x1x8x128xi32>
    %53 = vector.shape_cast %52 : vector<1x1x8x128xi32> to vector<8x128xi32>
    %54 = arith.addi %53, %42 : vector<8x128xi32>
    %c0_23 = arith.constant 0 : index
    %c1_24 = arith.constant 1 : index
    %c0_25 = arith.constant 0 : index
    %c0_26 = arith.constant 0 : index
    %55 = vector.load %arg4[%c0_23, %c1_24, %c0_25, %c0_26] : memref<1x3x8x128xi32, #tpu.memory_space<vmem>>, vector<1x1x8x128xi32>
    %56 = vector.shape_cast %55 : vector<1x1x8x128xi32> to vector<8x128xi32>
    %57 = vector.shape_cast %54 : vector<8x128xi32> to vector<1x1x8x128xi32>
    tpu.vector_store %arg4[%c0_23, %c1_24, %c0_25, %c0_26], %57 {strides = array<i32>} : memref<1x3x8x128xi32, #tpu.memory_space<vmem>>, vector<1x1x8x128xi32>,
    %c0_27 = arith.constant 0 : index
    %c2 = arith.constant 2 : index
    %c0_28 = arith.constant 0 : index
    %c0_29 = arith.constant 0 : index
    %58 = vector.load %arg4[%c0_27, %c2, %c0_28, %c0_29] : memref<1x3x8x128xi32, #tpu.memory_space<vmem>>, vector<1x1x8x128xi32>
    %59 = vector.shape_cast %58 : vector<1x1x8x128xi32> to vector<8x128xi32>
    %60 = arith.addi %59, %45 : vector<8x128xi32>
    %c0_30 = arith.constant 0 : index
    %c2_31 = arith.constant 2 : index
    %c0_32 = arith.constant 0 : index
    %c0_33 = arith.constant 0 : index
    %61 = vector.load %arg4[%c0_30, %c2_31, %c0_32, %c0_33] : memref<1x3x8x128xi32, #tpu.memory_space<vmem>>, vector<1x1x8x128xi32>
    %62 = vector.shape_cast %61 : vector<1x1x8x128xi32> to vector<8x128xi32>
    %63 = vector.shape_cast %60 : vector<8x128xi32> to vector<1x1x8x128xi32>
    tpu.vector_store %arg4[%c0_30, %c2_31, %c0_32, %c0_33], %63 {strides = array<i32>} : memref<1x3x8x128xi32, #tpu.memory_space<vmem>>, vector<1x1x8x128xi32>,
    return
  }
  func.func @transform_0(%arg0: i32, %arg1: i32) -> (i32, i32) {
    %c1_i32 = arith.constant 1 : i32
    %0 = arith.muli %arg0, %c1_i32 : i32
    %1 = arith.addi %0, %arg1 : i32
    %c0_i32 = arith.constant 0 : i32
    %2 = arith.minsi %1, %c0_i32 : i32
    %c0_i32_0 = arith.constant 0 : i32
    %c0_i32_1 = arith.constant 0 : i32
    return %2, %c0_i32_0 : i32, i32
  }
  func.func @transform_1(%arg0: i32, %arg1: i32) -> (i32, i32) {
    %c1_i32 = arith.constant 1 : i32
    %0 = arith.muli %arg0, %c1_i32 : i32
    %1 = arith.addi %0, %arg1 : i32
    %c0_i32 = arith.constant 0 : i32
    %2 = arith.minsi %1, %c0_i32 : i32
    %c0_i32_0 = arith.constant 0 : i32
    %c0_i32_1 = arith.constant 0 : i32
    return %2, %c0_i32_0 : i32, i32
  }
  func.func @transform_2(%arg0: i32, %arg1: i32) -> (i32, i32, i32, i32) {
    %c0_i32 = arith.constant 0 : i32
    %c0_i32_0 = arith.constant 0 : i32
    %c0_i32_1 = arith.constant 0 : i32
    %c0_i32_2 = arith.constant 0 : i32
    return %arg0, %c0_i32, %c0_i32_0, %c0_i32_1 : i32, i32, i32, i32
  }
}

</mosaic_0001>

<bundles_post_ra>
// kernel: tpu_custom_call.1
= control target key start
LH: loop header
LB: loop body
LE: loop exit
PB: predicated region body
PF: predicated region fallthrough
CT: control target
= control target key end

     0   :  { %7 = vsyncpa [#allocation3], 0  ;;  %s277_s0 = inlined_call_operand.hbm [shape: s32[16,128], index: 0, kind: input, shape index: {}]   ;;  %s278_s1 = inlined_call_operand.hbm [shape: s32[16,128], index: 1, kind: input, shape index: {}]   ;;  %s279_s2 = inlined_call_operand.hbm [shape: s32[1,3,8,128], index: 2, kind: output, shape index: {}]  }
   0x1   :  { %8 = vsyncpa [#allocation6], 0 }
   0x2   :  { %9 = vsyncpa [#allocation4], 0  ;;  %s208_s9 = smov [#allocation2]   ;;  %s136_s13 = scalar_lea.hbm %s277_s0, 256 }
   0x3   :  { %s21_s10 = sshll.u32 %s208_s9, 4  ;;  %p137_p0 = scmp.ne.s32.totalorder %s277_s0, %s136_s13  ;;  %s22_s10 = int_to_ptr.vmem [resolvable:$true] %s21_s10 }
   0x4   :  { %p140_p1 = scmp.lt.u32.totalorder %s136_s13, %s277_s0 }
   0x6   :  { %p142_p2 = pnand %p140_p1, %p137_p0 }
   0x8   :  { %145 = shalt.err (!%p142_p2)
}
   0x9   :  { %s146_s18 = scalar_lea.vmem %s22_s10, 256  ;;  %p151_p4 = scmp.lt.s32.totalorder %s22_s10, %s22_s10 }
   0xa   :  { %p147_p3 = scmp.ne.s32.totalorder %s22_s10, %s146_s18  ;;  %p152_p5 = scmp.lt.s32.totalorder %s146_s18, %s146_s18 }
   0xc   :  { %p153_p6 = por %p152_p5, %p151_p4 }
   0xe   :  { %p154_p7 = pnand %p153_p6, %p147_p3 }
  0x10   :  { %157 = shalt.err (!%p154_p7)
}
  0x11   :  { %s209_s19 = smov 128   ;;  %s210_s20 = smov 8  }
  0x12   :  { %27 = dma.hbm_to_vmem [thread:$0]  %s277_s0, 256, %s22_s10, [#allocation3], %s209_s19, %s209_s19, %s210_s20  }
  0x13   :  { %s211_s23 = smov [#allocation5]   ;;  %s158_s27 = scalar_lea.hbm %s278_s1, 256 }
  0x14   :  { %s39_s24 = sshll.u32 %s211_s23, 4  ;;  %p159_p8 = scmp.ne.s32.totalorder %s278_s1, %s158_s27  ;;  %s40_s24 = int_to_ptr.vmem [resolvable:$true] %s39_s24 }
  0x15   :  { %p162_p9 = scmp.lt.u32.totalorder %s158_s27, %s278_s1 }
  0x17   :  { %p164_p10 = pnand %p162_p9, %p159_p8 }
  0x19   :  { %167 = shalt.err (!%p164_p10)
}
  0x1a   :  { %s168_s4 = scalar_lea.vmem %s40_s24, 256  ;;  %p173_p12 = scmp.lt.s32.totalorder %s40_s24, %s40_s24 }
  0x1b   :  { %p169_p11 = scmp.ne.s32.totalorder %s40_s24, %s168_s4  ;;  %p174_p13 = scmp.lt.s32.totalorder %s168_s4, %s168_s4 }
  0x1d   :  { %p175_p0 = por %p174_p13, %p173_p12 }
  0x1f   :  { %p176_p1 = pnand %p175_p0, %p169_p11 }
  0x21   :  { %179 = shalt.err (!%p176_p1)
}
  0x22   :  { %45 = dma.hbm_to_vmem [thread:$0]  %s278_s1, 256, %s40_s24, [#allocation6], %s209_s19, %s209_s19, %s210_s20  }
  0x23   :  { %202 = dma.done.wait [#allocation3], 256  }
  0x24   :  { %203 = vsyncadd [#allocation3], 4294967040 }
  0x25   :  { %204 = dma.done.wait [#allocation6], 256  }
  0x26   :  { %205 = vsyncadd [#allocation6], 4294967040  ;;  %v67_v0 = vld [vmem:[#allocation2] sm:$0xff]  ;;  %v68_v1 = vld [vmem:[#allocation5] sm:$0xff]  ;;  %v212_v4 = vmov 0   ;;  %vm213_vm6 = vmmov 1  }
  0x27   :  { %v80_v2 = vld [vmem:[#allocation2 + $0x8] sm:$0xff]  ;;  %vm69_vm0 = vcmp.eq.s32.totalorder %v67_v0, %v68_v1  ;;  %vm71_vm1 = vcmp.ne.s32.totalorder %v67_v0, 0  ;;  %v82_v3 = vld [vmem:[#allocation5 + $0x8] sm:$0xff]  ;;  %vm72_vm9 = vcmp.ne.s32.totalorder %v68_v1, 0  ;;  %s214_s1 = smov [#allocation7]  }
  0x28   :  { %vm85_vm2 = vcmp.ne.s32.totalorder %v80_v2, 0  ;;  %vm73_vm3 = vmand %vm69_vm0, %vm71_vm1  ;;  %vm83_vm4 = vcmp.eq.s32.totalorder %v80_v2, %v82_v3  ;;  %vm86_vm11 = vcmp.ne.s32.totalorder %v82_v3, 0  ;;  %s112_s6 = sshll.u32 %s214_s1, 4  ;;  %s113_s6 = int_to_ptr.vmem [resolvable:$true] %s112_s6 }
  0x29   :  { %v74_v5 = vsel %vm73_vm3, 1, %v212_v4  ;;  %vm87_vm5 = vmand %vm83_vm4, %vm85_vm2  ;;  %s180_s7 = scalar_lea.vmem %s113_s6, 384  ;;  %p185_p3 = scmp.lt.s32.totalorder %s113_s6, %s113_s6 }
  0x2a   :  { %v88_v6 = vsel %vm87_vm5, 1, %v212_v4  ;;  %vm70_vm7 = vmxor %vm69_vm0, %vm213_vm6  ;;  %p181_p2 = scmp.ne.s32.totalorder %s113_s6, %s180_s7  ;;  %p186_p4 = scmp.lt.s32.totalorder %s180_s7, %s180_s7 }
  0x2b   :  { %v89_v7 = vadd.s32 %v88_v6, %v74_v5  ;;  %vm75_vm8 = vmand %vm70_vm7, %vm71_vm1 }
  0x2c   :  { %v76_v8 = vsel %vm75_vm8, 1, %v212_v4  ;;  %vm84_vm10 = vmxor %vm83_vm4, %vm213_vm6  ;;  %p187_p5 = por %p186_p4, %p185_p3 }
  0x2d   :  { %vm90_vm12 = vmand %vm84_vm10, %vm85_vm2  ;;  %98 = vst [vmem:[#allocation7] sm:$0xff] %v89_v7 }
  0x2e   :  { %v91_v9 = vsel %vm90_vm12, 1, %v212_v4  ;;  %vm77_vm13 = vmand %vm70_vm7, %vm72_vm9  ;;  %p188_p6 = pnand %p187_p5, %p181_p2 }
  0x2f   :  { %v92_v10 = vadd.s32 %v91_v9, %v76_v8  ;;  %v78_v11 = vsel %vm77_vm13, 1, %v212_v4  ;;  %vm93_vm14 = vmand %vm84_vm10, %vm86_vm11 }
  0x30   :  { %v94_v12 = vsel %vm93_vm14, 1, %v212_v4 }
  0x31   :  { %v95_v13 = vadd.s32 %v94_v12, %v78_v11  ;;  %102 = vst [vmem:[#allocation7 + $0x8] sm:$0xff] %v92_v10 }
  0x33   :  { %106 = vst [vmem:[#allocation7 + $0x10] sm:$0xff] %v95_v13 }
  0x34   :  { %191 = shalt.err (!%p188_p6)
}
  0x35   :  { %s192_s10 = scalar_lea.hbm %s279_s2, 384 }
  0x36   :  { %p193_p7 = scmp.ne.s32.totalorder %s279_s2, %s192_s10  ;;  %p196_p8 = scmp.lt.u32.totalorder %s192_s10, %s279_s2 }
  0x38   :  { %p198_p9 = pnand %p196_p8, %p193_p7 }
  0x3a   :  { %201 = shalt.err (!%p198_p9)
}
  0x3b   :  { %118 = dma.vmem_to_hbm [thread:$0]  %s113_s6, 384, %s279_s2, [#allocation4], %s209_s19, %s209_s19, %s210_s20  }
  0x3c   :  { %206 = dma.done.wait [#allocation4], 384  }
  0x3d   :  { %207 = vsyncadd [#allocation4], 4294966912 }
  0x3e   :  { %122 = vsyncpa [#allocation3], 1 }
  0x3f   :  { %123 = vsyncpa [#allocation6], 1 }
  0x40   :  { %124 = vsyncpa [#allocation4], 1 }

</bundles_post_ra>
